<compile_context>
chip_gen: v5e
topology: v5e:2x2
jax: 0.10.0
libtpu: 0.0.40
codegen_flags: <defaults>
</compile_context>

<pallas_src>
import jax
import jax.numpy as jnp
from jax import lax
from jax.experimental import pallas as pl
from jax.experimental.pallas import tpu as pltpu


# -----------------------------------------------------------------------------
# Hot-loop kernel: streaming batch matmul  y = x @ W_eff.
# -----------------------------------------------------------------------------
def _make_xw_kernel(mxu_dtype):
    def _xw_kernel(x_ref, w_ref, y_ref):
        x = x_ref[...]
        w = w_ref[...]
        if mxu_dtype is not None:
            # In-kernel cast: HBM traffic stays 4 B/elem for x (single read), the VPU
            # cast rides in otherwise-idle VALU slots, MXU still gets bf16 operands.
            x = x.astype(mxu_dtype)
            w = w.astype(mxu_dtype)
        y_ref[...] = jnp.dot(x, w, preferred_element_type=jnp.float32).astype(y_ref.dtype)
    return _xw_kernel


# -----------------------------------------------------------------------------
# Parameter-only W assembly (plain JAX, hoisted out of the batch hot loop).
# -----------------------------------------------------------------------------
def _assemble_w(P, L_param, U_param, sign_S, log_S, mode):
    D = P.shape[0]
    f32 = jnp.float32
    l_mask = jnp.tril(jnp.ones((D, D), f32), -1)
    u_mask = jnp.triu(jnp.ones((D, D), f32), 1)
    I = jnp.eye(D, dtype=f32)
    L = L_param.astype(f32) * l_mask + I
    U = U_param.astype(f32) * u_mask + jnp.diag(sign_S.astype(f32) * jnp.exp(log_S.astype(f32)))
    if mode == "direct":
        W = jnp.dot(jnp.dot(P.astype(f32), L, precision="highest"), U, precision="highest")
    else:
        # W^{-1} = U^{-1} L^{-1} P^T via triangular solves (better conditioned than inv(W)).
        # TODO(synk): torch.inverse(W) has no in-kernel Pallas equivalent; this is
        # parameter-only work done once in plain JAX off the hot path.
        L_inv_Pt = jax.scipy.linalg.solve_triangular(
            L, P.astype(f32).T, lower=True, unit_diagonal=True)
        W = jax.scipy.linalg.solve_triangular(U, L_inv_Pt, lower=False)
    return W


# -----------------------------------------------------------------------------
# Wrapper: forward pass of LUInvertibleMM.
# -----------------------------------------------------------------------------
def lu_invertible_mm(x, P, L_param, U_param, sign_S, log_S, mode="direct",
                     block_rows=8192, stream_dtype=jnp.bfloat16, out_dtype=None):
    """Pallas forward of LUInvertibleMM. Returns (y, logdet) like the torch module.

    stream_dtype: MXU operand dtype inside the kernel (bf16 default; None => full f32
                  matmul for users who need tight direct/inverse round-trip error).
    out_dtype:    dtype of y (defaults to x.dtype; pass bf16 to halve output traffic).
    """
    B, D = x.shape
    out_dtype = jnp.dtype(out_dtype) if out_dtype is not None else jnp.dtype(x.dtype)

    # --- parameter-only work (one small XLA fusion, no extra kernel launch) ---
    W = _assemble_w(P, L_param, U_param, sign_S, log_S, mode)          # (D, D) f32
    logdet_scalar = jnp.sum(log_S.astype(jnp.float32))
    if mode != "direct":
        logdet_scalar = -logdet_scalar

    # --- lane-density packing: fold `pack` batch rows into one 128-wide lane row ---
    # NOTE: if D does not divide 128, pack falls back to 1 and the output lane width is
    # D < 128 (masked partial stores) -- correct but a known perf cliff.
    pack = 128 // D if (D < 128 and 128 % D == 0) else 1
    x_f = x.astype(jnp.float32)
    if pack > 1 and B % pack != 0:
        # Fallback only; callers should keep B a multiple of pack to avoid this pass.
        B_pad = ((B + pack - 1) // pack) * pack
        x_f = jnp.pad(x_f, ((0, B_pad - B), (0, 0)))
    else:
        B_pad = B
    De = D * pack
    B_rows = B_pad // pack
    x_packed = x_f.reshape(B_rows, De)                                  # stays f32
    W_eff = jnp.kron(jnp.eye(pack, dtype=jnp.float32), W) if pack > 1 else W

    # --- batch tiling ---
    tm = min(block_rows, B_rows)
    # Keep >= 2 grid steps when possible so both v7x TensorCores get work
    # (harmless on the single-TC v5e/v6e).
    if B_rows > 8:
        half = -(-B_rows // 2)                 # cdiv(B_rows, 2)
        half = -(-half // 8) * 8               # round up to sublane multiple
        if half < B_rows:
            tm = min(tm, half)
    if tm < B_rows:
        tm = max(8, (tm // 8) * 8)             # sublane-aligned partial-grid tiles
    grid = (pl.cdiv(B_rows, tm),)

    # VMEM budget from the actual tiles: double-buffered f32 x and out-dtype y tiles
    # plus the resident W_eff; capped well under v7x's 64 MiB physical VMEM.
    need = (2 * tm * De * 4                       # x tiles (f32, double-buffered)
            + 2 * tm * De * out_dtype.itemsize    # y tiles (double-buffered)
            + 2 * De * De * 4)                    # W_eff (f32, resident)
    vmem_limit = int(min(48 * 1024 * 1024, max(4 * 1024 * 1024, need + (2 << 20))))

    y_packed = pl.pallas_call(
        _make_xw_kernel(stream_dtype),
        out_shape=jax.ShapeDtypeStruct((B_rows, De), out_dtype),
        grid=grid,
        in_specs=[pl.BlockSpec((tm, De), lambda i: (i, 0)),     # streamed x tiles
                  pl.BlockSpec((De, De), lambda i: (0, 0))],    # W resident across grid
        out_specs=pl.BlockSpec((tm, De), lambda i: (i, 0)),
        compiler_params=pltpu.CompilerParams(
            dimension_semantics=("parallel",),
            vmem_limit_bytes=vmem_limit),
    )(x_packed, W_eff)

    y = y_packed.reshape(B_pad, D)
    if B_pad != B:
        y = y[:B]
    logdet = jnp.full((B, 1), logdet_scalar, dtype=jnp.float32)
    return y, logdet


# -----------------------------------------------------------------------------
# Parameter init mirroring LUInvertibleMM.__init__ and a pure-JAX reference.
# -----------------------------------------------------------------------------
def init_params(key, num_inputs):
    D = num_inputs
    A = jax.random.normal(key, (D, D), dtype=jnp.float32)
    Q, R = jnp.linalg.qr(A)
    Q = Q * jnp.sign(jnp.diag(R))[None, :]          # deterministic orthogonal init

    P, L, U = jax.scipy.linalg.lu(Q)                # Q = P @ L @ U
    S = jnp.diag(U)
    sign_S = jnp.sign(S)
    log_S = jnp.log(jnp.abs(S))
    return P, L, U, sign_S, log_S


def reference_forward(x, P, L_param, U_param, sign_S, log_S, mode="direct"):
    hdot = lambda a, b: jnp.dot(a, b, precision=lax.Precision.HIGHEST)
    D = L_param.shape[0]
    l_mask = jnp.tril(jnp.ones((D, D), jnp.float32), -1)
    u_mask = l_mask.T
    I = jnp.eye(D, dtype=jnp.float32)
    L = L_param * l_mask + I
    U = U_param * u_mask + jnp.diag(sign_S * jnp.exp(log_S))
    W = hdot(hdot(P, L), U)
    if mode != "direct":
        W = jnp.linalg.inv(W)
        s = -jnp.sum(log_S)
    else:
        s = jnp.sum(log_S)
    y = hdot(x, W)
    logdet = jnp.full((x.shape[0], 1), s, dtype=jnp.float32)
    return y, logdet


if __name__ == "__main__":
    key = jax.random.PRNGKey(0)
    k_param, k_x1, k_x2 = jax.random.split(key, 3)

    num_inputs = 32
    P, Lp, Up, sign_S, log_S = init_params(k_param, num_inputs)

    # Small case (flat feature vectors, as the torch module is used).
    x_small = jax.random.normal(k_x1, (8, num_inputs), dtype=jnp.float32)
    y, logdet = lu_invertible_mm(x_small, P, Lp, Up, sign_S, log_S)
    jax.block_until_ready((y, logdet))

    y_ref, logdet_ref = reference_forward(x_small, P, Lp, Up, sign_S, log_S)
    # MXU operands are bf16 (f32 accumulate) -> compare against f32 reference loosely.
    assert jnp.allclose(y, y_ref, atol=5e-2, rtol=5e-2), float(jnp.max(jnp.abs(y - y_ref)))
    assert jnp.allclose(logdet, logdet_ref, atol=1e-5, rtol=1e-5)

    # Larger batch exercising the multi-tile (2-step, megacore-shardable) grid, both modes.
    x_big = jax.random.normal(k_x2, (512, num_inputs), dtype=jnp.float32)
    for mode in ("direct", "inverse"):
        y2, ld2 = lu_invertible_mm(x_big, P, Lp, Up, sign_S, log_S,
                                   mode=mode, block_rows=64)
        jax.block_until_ready((y2, ld2))
        y2_ref, ld2_ref = reference_forward(x_big, P, Lp, Up, sign_S, log_S, mode=mode)
        assert jnp.allclose(y2, y2_ref, atol=5e-2, rtol=5e-2), \
            float(jnp.max(jnp.abs(y2 - y2_ref)))
        assert jnp.allclose(ld2, ld2_ref, atol=1e-5, rtol=1e-5)

    # High-precision streaming path (full f32 MXU operands) for tight inversion error.
    for mode in ("direct", "inverse"):
        y3, ld3 = lu_invertible_mm(x_big, P, Lp, Up, sign_S, log_S,
                                   mode=mode, stream_dtype=None)
        jax.block_until_ready((y3, ld3))
        y3_ref, ld3_ref = reference_forward(x_big, P, Lp, Up, sign_S, log_S, mode=mode)
        assert jnp.allclose(y3, y3_ref, atol=2e-3, rtol=2e-3), \
            float(jnp.max(jnp.abs(y3 - y3_ref)))
        assert jnp.allclose(ld3, ld3_ref, atol=1e-5, rtol=1e-5)

    print("KERNEL_OK")
</pallas_src>

<mosaic_0001>
module attributes {stable_mosaic.version = 11 : i64} {
  func.func @_xw_kernel(%arg0: i32, %arg1: memref<2x128xf32, #tpu.memory_space<vmem>>, %arg2: memref<128x128xf32, #tpu.memory_space<vmem>>, %arg3: memref<2x128xf32, #tpu.memory_space<vmem>>) attributes {dimension_semantics = [#tpu.dimension_semantics<parallel>], iteration_bounds = array<i64: 1>, scalar_prefetch = 0 : i64, scratch_operands = 0 : i64, tpu.core_type = #tpu.core_type<tc>, window_params = [{transform_indices = @transform_0, window_bounds = array<i64: 2, 128>}, {pipeline_mode = #tpu.pipeline_mode<synchronous>, transform_indices = @transform_1, window_bounds = array<i64: 128, 128>}, {transform_indices = @transform_2, window_bounds = array<i64: 2, 128>}]} {
    %c0 = arith.constant 0 : index
    %c0_0 = arith.constant 0 : index
    %0 = vector.load %arg1[%c0, %c0_0] : memref<2x128xf32, #tpu.memory_space<vmem>>, vector<2x128xf32>
    %c0_1 = arith.constant 0 : index
    %c0_2 = arith.constant 0 : index
    %1 = vector.load %arg2[%c0_1, %c0_2] : memref<128x128xf32, #tpu.memory_space<vmem>>, vector<128x128xf32>
    %2 = arith.truncf %0 : vector<2x128xf32> to vector<2x128xbf16>
    %3 = arith.truncf %1 : vector<128x128xf32> to vector<128x128xbf16>
    %cst = arith.constant dense<0.000000e+00> : vector<2x128xf32>
    %4 = tpu.matmul %2, %3, %cst {dimension_numbers = #tpu.dot_dimension_numbers<[1], [0], [0], [1], [0, 0, 1, 1], [], []>} : vector<2x128xbf16>, vector<128x128xbf16>, vector<2x128xf32> -> vector<2x128xf32>
    %c0_3 = arith.constant 0 : index
    %c0_4 = arith.constant 0 : index
    %5 = vector.load %arg3[%c0_3, %c0_4] : memref<2x128xf32, #tpu.memory_space<vmem>>, vector<2x128xf32>
    tpu.vector_store %arg3[%c0_3, %c0_4], %4 {strides = array<i32>} : memref<2x128xf32, #tpu.memory_space<vmem>>, vector<2x128xf32>,
    return
  }
  func.func @transform_0(%arg0: i32) -> (i32, i32) {
    %c0_i32 = arith.constant 0 : i32
    %c0_i32_0 = arith.constant 0 : i32
    return %arg0, %c0_i32 : i32, i32
  }
  func.func @transform_1(%arg0: i32) -> (i32, i32) {
    %c0_i32 = arith.constant 0 : i32
    %c0_i32_0 = arith.constant 0 : i32
    %c0_i32_1 = arith.constant 0 : i32
    return %c0_i32, %c0_i32_0 : i32, i32
  }
  func.func @transform_2(%arg0: i32) -> (i32, i32) {
    %c0_i32 = arith.constant 0 : i32
    %c0_i32_0 = arith.constant 0 : i32
    return %arg0, %c0_i32 : i32, i32
  }
}

</mosaic_0001>

<bundles_post_ra>
// kernel: tpu_custom_call.1
= control target key start
LH: loop header
LB: loop body
LE: loop exit
PB: predicated region body
PF: predicated region fallthrough
CT: control target
= control target key end

     0   :  { %7 = vsyncpa [#allocation3], 0  ;;  %s212_s0 = inlined_call_operand.hbm [shape: f32[2,128], index: 0, kind: input, shape index: {}]   ;;  %s213_s1 = inlined_call_operand.hbm [shape: f32[128,128], index: 1, kind: input, shape index: {}]   ;;  %s214_s2 = inlined_call_operand.hbm [shape: f32[2,128], index: 2, kind: output, shape index: {}]  }
   0x1   :  { %8 = vsyncpa [#allocation6], 0 }
   0x2   :  { %9 = vsyncpa [#allocation4], 0  ;;  %s15_s11 = sshll.u32 %s212_s0, 4  ;;  %s183_s12 = smov [#allocation2]   ;;  %s16_s11 = int_to_ptr.hbm [resolvable:$true] %s15_s11 }
   0x3   :  { %s17_s13 = sshll.u32 %s183_s12, 4  ;;  %s25_s16 = sshll.u32 %s213_s1, 4  ;;  %s18_s13 = int_to_ptr.vmem [resolvable:$true] %s17_s13  ;;  %s26_s16 = int_to_ptr.hbm [resolvable:$true] %s25_s16 }
   0x4   :  { %20 = dma.hbm_to_vmem [thread:$0]  %s16_s11, 32, %s18_s13, [#allocation3]  }
   0x5   :  { %s184_s17 = smov [#allocation5]   ;;  %s185_s19 = smov 128  }
   0x6   :  { %s27_s18 = sshll.u32 %s184_s17, 4  ;;  %s186_s20 = smov 8   ;;  %s28_s18 = int_to_ptr.vmem [resolvable:$true] %s27_s18 }
   0x7   :  { %33 = dma.hbm_to_vmem [thread:$0]  %s26_s16, 2048, %s28_s18, [#allocation6], %s185_s19, %s185_s19, %s186_s20  }
   0x8   :  { %177 = dma.done.wait [#allocation3], 32  }
   0x9   :  { %178 = vsyncadd [#allocation3], 4294967264 }
   0xa   :  { %179 = dma.done.wait [#allocation6], 2048  }
   0xb   :  { %180 = vsyncadd [#allocation6], 4294965248  ;;  %v57_v0 = vld [vmem:[#allocation5 + $0x70] sm:$0xff]  ;;  %v58_v1 = vld [vmem:[#allocation5 + $0x78] sm:$0xff]  ;;  %s187_s0 = smov [#allocation7]   ;;  %s89_s23 = sshll.u32 %s214_s2, 4  ;;  %s90_s23 = int_to_ptr.hbm [resolvable:$true] %s89_s23 }
   0xc   :  { %v55_v2 = vld [vmem:[#allocation5 + $0x60] sm:$0xff]  ;;  %v67_v3 = vpack.c.bf16 %v58_v1, %v57_v0  ;;  %v56_v4 = vld [vmem:[#allocation5 + $0x68] sm:$0xff]  ;;  %v53_v6 = vld [vmem:[#allocation5 + $0x50] sm:$0xff]  ;;  %s87_s1 = sshll.u32 %s187_s0, 4  ;;  %s88_s1 = int_to_ptr.vmem [resolvable:$true] %s87_s1 }
   0xd   :  { %v66_v5 = vpack.c.bf16 %v56_v4, %v55_v2  ;;  %v54_v7 = vld [vmem:[#allocation5 + $0x58] sm:$0xff]  ;;  %v51_v9 = vld [vmem:[#allocation5 + $0x40] sm:$0xff]  ;;  %v52_v10 = vld [vmem:[#allocation5 + $0x48] sm:$0xff] }
   0xe   :  { %68 = vmatpush.bf16.msra.mxu0 %v67_v3  ;;  %v65_v8 = vpack.c.bf16 %v54_v7, %v53_v6  ;;  %v64_v11 = vpack.c.bf16 %v52_v10, %v51_v9  ;;  %v49_v12 = vld [vmem:[#allocation5 + $0x30] sm:$0xff]  ;;  %v50_v13 = vld [vmem:[#allocation5 + $0x38] sm:$0xff]  ;;  %v47_v15 = vld [vmem:[#allocation5 + $0x20] sm:$0xff] }
   0xf   :  { %v63_v14 = vpack.c.bf16 %v50_v13, %v49_v12  ;;  %v48_v16 = vld [vmem:[#allocation5 + $0x28] sm:$0xff]  ;;  %v45_v18 = vld [vmem:[#allocation5 + $0x10] sm:$0xff]  ;;  %v46_v19 = vld [vmem:[#allocation5 + $0x18] sm:$0xff] }
  0x10   :  { %v62_v17 = vpack.c.bf16 %v48_v16, %v47_v15  ;;  %v61_v20 = vpack.c.bf16 %v46_v19, %v45_v18  ;;  %v43_v21 = vld [vmem:[#allocation5] sm:$0xff]  ;;  %v44_v22 = vld [vmem:[#allocation5 + $0x8] sm:$0xff]  ;;  %v42_v24 = vld [vmem:[#allocation2] sm:$0x3] }
  0x11   :  { %v60_v23 = vpack.c.bf16 %v44_v22, %v43_v21  ;;  %v59_v25 = vpack.c.bf16 %v42_v24, %v42_v24 }
  0x12   :  { %69 = vmatpush.bf16.msra.mxu0 %v66_v5 }
  0x16   :  { %70 = vmatpush.bf16.msra.mxu0 %v65_v8 }
  0x1a   :  { %71 = vmatpush.bf16.msra.mxu0 %v64_v11 }
  0x1e   :  { %72 = vmatpush.bf16.msra.mxu0 %v63_v14 }
  0x22   :  { %73 = vmatpush.bf16.msra.mxu0 %v62_v17 }
  0x26   :  { %74 = vmatpush.bf16.msra.mxu0 %v61_v20 }
  0x2a   :  { %75 = vmatpush.bf16.msra.mxu0 %v60_v23 }
  0x2d   :  { %76 = vmatmul.bf16.vlgmr.msra.gmra.mxu0 %v59_v25 }
  0xaa   :  { %v77_v26 = vpop.f32.mrf.mxu0 }
  0xab   :  { %81 = vst [vmem:[#allocation7] sm:$0x3] %v77_v26 }
  0xac   :  { %92 = dma.vmem_to_hbm [thread:$0]  %s88_s1, 32, %s90_s23, [#allocation4]  }
  0xb2   :  { %v79_v27 = vpop.f32.mrf.mxu0 }
  0xb3   :  { %181 = dma.done.wait [#allocation4], 32  }
  0xb4   :  { %182 = vsyncadd [#allocation4], 4294967264 }
  0xb5   :  { %97 = vsyncpa [#allocation3], 1 }
  0xb6   :  { %98 = vsyncpa [#allocation6], 1 }
  0xb7   :  { %99 = vsyncpa [#allocation4], 1 }

</bundles_post_ra>
